<compile_context>
chip_gen: v7x
topology: tpu7x:2x2x1
jax: 0.10.0
libtpu: 0.0.40
codegen_flags: <defaults>
</compile_context>

<pallas_src>
import functools
import math

import jax
import jax.numpy as jnp
from jax import lax
from jax.experimental import pallas as pl
from jax.experimental.pallas import tpu as pltpu


def _softplus(x):
    # torch.nn.Softplus(beta=1): branch-free, numerically stable form.
    return jnp.maximum(x, 0.0) + jnp.log1p(jnp.exp(-jnp.abs(x)))


def _row_reduce(p):
    """Sum over the sublane (row) axis of a (R, C) tile -> (1, C).

    Folds rows pairwise on the VPU until <= 8 sublanes remain so only one
    cross-sublane XLU reduction is emitted.
    """
    r = p.shape[0]
    while r > 8 and r % 2 == 0:
        half = r // 2
        p = p[:half, :] + p[half:, :]
        r = half
    return jnp.sum(p, axis=0, keepdims=True)


def _mlp_kernel(x_ref, w1_ref, b1_ref, w2t_ref, b2_ref, o_ref, *, chunk, n_chunks):
    # x_ref  : (IN, TB)    batch-on-lanes activation tile (lane-dense TB)
    # w1_ref : (HID, IN)   layer-1 weight (PyTorch (out, in) layout), resident
    # b1_ref : (HID, 1)
    # w2t_ref: (HID, OUT)  layer-2 weight transposed to (in, out), resident
    # b2_ref : (OUT, 1)
    # o_ref  : (OUT, TB)
    w1 = w1_ref[...].astype(jnp.float32)      # (HID, IN)
    b1 = b1_ref[...].astype(jnp.float32)      # (HID, 1)
    w2t = w2t_ref[...].astype(jnp.float32)    # (HID, OUT)
    b2 = b2_ref[...].astype(jnp.float32)      # (OUT, 1)
    in_features = w1.shape[1]
    out_features = w2t.shape[1]

    def process_chunk(start):
        x = x_ref[:, pl.ds(start, chunk)].astype(jnp.float32)     # (IN, chunk)

        # ---- Layer 1: h = W1 @ x + b1 as IN broadcast-FMAs on the VPU ----
        h = w1[:, 0:1] * x[0:1, :] + b1                           # (HID, chunk)
        for k in range(1, in_features):                           # unrolled
            h = h + w1[:, k:k + 1] * x[k:k + 1, :]

        # ---- Softplus (EUP exp/log1p, branch-free) ----
        h = _softplus(h)

        # ---- Layer 2: per-row multiply + folded sublane reduction, direct store ----
        for j in range(out_features):
            row = _row_reduce(h * w2t[:, j:j + 1]) + b2[j:j + 1, :]   # (1, chunk)
            o_ref[j:j + 1, pl.ds(start, chunk)] = row.astype(o_ref.dtype)

    if n_chunks <= 8:
        # Short fixed trip count: unroll at trace time (static offsets).
        for c in range(n_chunks):
            process_chunk(c * chunk)
    else:
        def body(c, carry):
            process_chunk(pl.multiple_of(c * chunk, chunk))
            return carry
        lax.fori_loop(0, n_chunks, body, 0)


def _round_up(v, m):
    return ((v + m - 1) // m) * m


def schrodinger_fcnn_forward(x, w1, b1, w2, b2, *, tile_b=16384, chunk_b=512,
                             feature_major=False):
    """Fused SchrodingerFCNN forward: softplus(x @ W1.T + b1) @ W2.T + b2.

    Arguments use the PyTorch nn.Linear layout:
      x : (B, IN)  (or (IN, B) if feature_major=True),
      w1: (HID, IN), b1: (HID,), w2: (OUT, HID), b2: (OUT,)
    Returns (B, OUT) in x.dtype. All HBM-resident tensors keep their dtype
    (bf16 stays bf16); in-kernel math is float32.
    """
    if feature_major:
        IN, B = x.shape
    else:
        B, IN = x.shape
    HID = w1.shape[0]
    OUT = w2.shape[0]

    # ---- Batch tile (lane-dense, multiple of 128) ----
    lanes = _round_up(B, 128)
    tb = max(128, min(_round_up(int(tile_b), 128), lanes))
    # Keep >= 2 grid steps when the batch allows it so the "parallel" axis can
    # split across both v7x TensorCores (negligible cost on single-TC v5e/v6e).
    if lanes <= tb and lanes >= 256:
        tb = _round_up((lanes + 1) // 2, 128)
    n_steps = -(-B // tb)
    Bp = n_steps * tb

    # ---- Inner lane-chunk size: keep (HID, chunk) + temporaries in vregs ----
    chunk = max(128, min(_round_up(int(chunk_b), 128), tb))
    while tb % chunk:
        chunk -= 128
    n_chunks = tb // chunk

    # ---- Layout plumbing (native dtype; no float32 upcast) ----
    x_t = x if feature_major else x.T                              # (IN, B)
    if Bp != B:
        x_t = jnp.pad(x_t, ((0, 0), (0, Bp - B)))                  # zero cols sliced off later
    b1_c = b1.reshape(HID, 1)
    w2_t = w2.T                                                    # (HID, OUT)
    b2_c = b2.reshape(OUT, 1)

    itemsize = jnp.dtype(x.dtype).itemsize
    w_itemsize = jnp.dtype(w1.dtype).itemsize
    cost = pl.CostEstimate(
        flops=int(B) * (2 * IN * HID + 2 * HID * OUT),
        transcendentals=2 * int(B) * HID,
        bytes_accessed=int(B) * (IN + OUT) * itemsize
        + (HID * IN + HID + HID * OUT + OUT) * w_itemsize,
    )

    # VMEM budget from the chosen tile (double-buffered x/out tiles + slack);
    # stays well under v7x's 64 MiB physical VMEM.
    block_bytes = (IN + OUT) * tb * itemsize
    vmem_limit = int(min(64 * 1024 * 1024,
                         max(16 * 1024 * 1024, 4 * block_bytes + (4 << 20))))

    kernel = functools.partial(_mlp_kernel, chunk=chunk, n_chunks=n_chunks)

    y_t = pl.pallas_call(
        kernel,
        out_shape=jax.ShapeDtypeStruct((OUT, Bp), x.dtype),
        grid_spec=pltpu.PrefetchScalarGridSpec(
            num_scalar_prefetch=0,
            grid=(n_steps,),
            in_specs=[
                pl.BlockSpec((IN, tb), lambda i: (0, i)),     # x: tiled over batch (lanes)
                pl.BlockSpec((HID, IN), lambda i: (0, 0)),    # W1: resident
                pl.BlockSpec((HID, 1), lambda i: (0, 0)),     # b1
                pl.BlockSpec((HID, OUT), lambda i: (0, 0)),   # W2^T
                pl.BlockSpec((OUT, 1), lambda i: (0, 0)),     # b2
            ],
            out_specs=pl.BlockSpec((OUT, tb), lambda i: (0, i)),
        ),
        compiler_params=pltpu.CompilerParams(
            dimension_semantics=("parallel",),
            vmem_limit_bytes=vmem_limit,
        ),
        cost_estimate=cost,
    )(x_t, w1, b1_c, w2_t, b2_c)

    return y_t[:, :B].T                                        # (B, OUT)


def init_linear_params(key, fan_in, fan_out, dtype=jnp.float32):
    """nn.Linear-style init: U(-1/sqrt(fan_in), +1/sqrt(fan_in)), (out, in) layout."""
    k_w, k_b = jax.random.split(key)
    bound = 1.0 / math.sqrt(fan_in)
    w = jax.random.uniform(k_w, (fan_out, fan_in), dtype, -bound, bound)
    b = jax.random.uniform(k_b, (fan_out,), dtype, -bound, bound)
    return w, b


def reference_forward(x, w1, b1, w2, b2):
    h = _softplus(x @ w1.T + b1)
    return h @ w2.T + b2


if __name__ == "__main__":
    # SchrodingerFCNN(input_size=4, hidden_sizes=[32], output_size=2)
    input_size, hidden_size, output_size = 4, 32, 2
    batch = 16

    key = jax.random.PRNGKey(0)
    k_x, k_l1, k_l2 = jax.random.split(key, 3)

    x = jax.random.normal(k_x, (batch, input_size), jnp.float32)
    w1, b1 = init_linear_params(k_l1, input_size, hidden_size)
    w2, b2 = init_linear_params(k_l2, hidden_size, output_size)

    fwd = jax.jit(functools.partial(schrodinger_fcnn_forward,
                                    tile_b=16384, chunk_b=512))
    out = jax.block_until_ready(fwd(x, w1, b1, w2, b2))

    ref = reference_forward(x, w1, b1, w2, b2)
    assert out.shape == (batch, output_size)
    assert jnp.allclose(out, ref, atol=1e-5, rtol=1e-5), "mismatch vs reference"

    print("KERNEL_OK")
</pallas_src>

<mosaic_0001>
module attributes {stable_mosaic.version = 11 : i64} {
  func.func @_mlp_kernel(%arg0: i32, %arg1: memref<4x128xf32, #tpu.memory_space<vmem>>, %arg2: memref<32x4xf32, #tpu.memory_space<vmem>>, %arg3: memref<32x1xf32, #tpu.memory_space<vmem>>, %arg4: memref<32x2xf32, #tpu.memory_space<vmem>>, %arg5: memref<2x1xf32, #tpu.memory_space<vmem>>, %arg6: memref<2x128xf32, #tpu.memory_space<vmem>>) attributes {dimension_semantics = [#tpu.dimension_semantics<parallel>], iteration_bounds = array<i64: 1>, scalar_prefetch = 0 : i64, scratch_operands = 0 : i64, tpu.core_type = #tpu.core_type<tc>, window_params = [{transform_indices = @transform_0, window_bounds = array<i64: 4, 128>}, {pipeline_mode = #tpu.pipeline_mode<synchronous>, transform_indices = @transform_1, window_bounds = array<i64: 32, 4>}, {pipeline_mode = #tpu.pipeline_mode<synchronous>, transform_indices = @transform_2, window_bounds = array<i64: 32, 1>}, {pipeline_mode = #tpu.pipeline_mode<synchronous>, transform_indices = @transform_3, window_bounds = array<i64: 32, 2>}, {pipeline_mode = #tpu.pipeline_mode<synchronous>, transform_indices = @transform_4, window_bounds = array<i64: 2, 1>}, {transform_indices = @transform_5, window_bounds = array<i64: 2, 128>}]} {
    %c0 = arith.constant 0 : index
    %c0_0 = arith.constant 0 : index
    %0 = vector.load %arg2[%c0, %c0_0] : memref<32x4xf32, #tpu.memory_space<vmem>>, vector<32x4xf32>
    %c0_1 = arith.constant 0 : index
    %c0_2 = arith.constant 0 : index
    %1 = vector.load %arg3[%c0_1, %c0_2] : memref<32x1xf32, #tpu.memory_space<vmem>>, vector<32x1xf32>
    %c0_3 = arith.constant 0 : index
    %c0_4 = arith.constant 0 : index
    %2 = vector.load %arg4[%c0_3, %c0_4] : memref<32x2xf32, #tpu.memory_space<vmem>>, vector<32x2xf32>
    %c0_5 = arith.constant 0 : index
    %c0_6 = arith.constant 0 : index
    %3 = vector.load %arg5[%c0_5, %c0_6] : memref<2x1xf32, #tpu.memory_space<vmem>>, vector<2x1xf32>
    %c0_7 = arith.constant 0 : index
    %c0_8 = arith.constant 0 : index
    %4 = vector.load %arg1[%c0_7, %c0_8] : memref<4x128xf32, #tpu.memory_space<vmem>>, vector<4x128xf32>
    %5 = vector.extract_strided_slice %0 {offsets = [0, 0], sizes = [32, 1], strides = [1, 1]} : vector<32x4xf32> to vector<32x1xf32>
    %6 = vector.extract_strided_slice %4 {offsets = [0, 0], sizes = [1, 128], strides = [1, 1]} : vector<4x128xf32> to vector<1x128xf32>
    %7 = vector.broadcast %5 : vector<32x1xf32> to vector<32x128xf32>
    %8 = vector.broadcast %6 : vector<1x128xf32> to vector<32x128xf32>
    %9 = arith.mulf %7, %8 : vector<32x128xf32>
    %10 = vector.broadcast %1 : vector<32x1xf32> to vector<32x128xf32>
    %11 = arith.addf %9, %10 : vector<32x128xf32>
    %12 = vector.extract_strided_slice %0 {offsets = [0, 1], sizes = [32, 1], strides = [1, 1]} : vector<32x4xf32> to vector<32x1xf32>
    %13 = vector.extract_strided_slice %4 {offsets = [1, 0], sizes = [1, 128], strides = [1, 1]} : vector<4x128xf32> to vector<1x128xf32>
    %14 = vector.broadcast %12 : vector<32x1xf32> to vector<32x128xf32>
    %15 = vector.broadcast %13 : vector<1x128xf32> to vector<32x128xf32>
    %16 = arith.mulf %14, %15 : vector<32x128xf32>
    %17 = arith.addf %11, %16 : vector<32x128xf32>
    %18 = vector.extract_strided_slice %0 {offsets = [0, 2], sizes = [32, 1], strides = [1, 1]} : vector<32x4xf32> to vector<32x1xf32>
    %19 = vector.extract_strided_slice %4 {offsets = [2, 0], sizes = [1, 128], strides = [1, 1]} : vector<4x128xf32> to vector<1x128xf32>
    %20 = vector.broadcast %18 : vector<32x1xf32> to vector<32x128xf32>
    %21 = vector.broadcast %19 : vector<1x128xf32> to vector<32x128xf32>
    %22 = arith.mulf %20, %21 : vector<32x128xf32>
    %23 = arith.addf %17, %22 : vector<32x128xf32>
    %24 = vector.extract_strided_slice %0 {offsets = [0, 3], sizes = [32, 1], strides = [1, 1]} : vector<32x4xf32> to vector<32x1xf32>
    %25 = vector.extract_strided_slice %4 {offsets = [3, 0], sizes = [1, 128], strides = [1, 1]} : vector<4x128xf32> to vector<1x128xf32>
    %26 = vector.broadcast %24 : vector<32x1xf32> to vector<32x128xf32>
    %27 = vector.broadcast %25 : vector<1x128xf32> to vector<32x128xf32>
    %28 = arith.mulf %26, %27 : vector<32x128xf32>
    %29 = arith.addf %23, %28 : vector<32x128xf32>
    %cst = arith.constant 0.000000e+00 : f32
    %30 = vector.broadcast %cst : f32 to vector<32x128xf32>
    %31 = arith.maximumf %29, %30 : vector<32x128xf32>
    %32 = math.absf %29 : vector<32x128xf32>
    %cst_9 = arith.constant 0.000000e+00 : f32
    %33 = vector.broadcast %cst_9 : f32 to vector<32x128xf32>
    %34 = arith.subf %33, %32 : vector<32x128xf32>
    %35 = math.exp %34 : vector<32x128xf32>
    %36 = math.log1p %35 : vector<32x128xf32>
    %37 = arith.addf %31, %36 : vector<32x128xf32>
    %38 = vector.extract_strided_slice %2 {offsets = [0, 0], sizes = [32, 1], strides = [1, 1]} : vector<32x2xf32> to vector<32x1xf32>
    %39 = vector.broadcast %38 : vector<32x1xf32> to vector<32x128xf32>
    %40 = arith.mulf %37, %39 : vector<32x128xf32>
    %41 = vector.extract_strided_slice %40 {offsets = [0, 0], sizes = [16, 128], strides = [1, 1]} : vector<32x128xf32> to vector<16x128xf32>
    %42 = vector.extract_strided_slice %40 {offsets = [16, 0], sizes = [16, 128], strides = [1, 1]} : vector<32x128xf32> to vector<16x128xf32>
    %43 = arith.addf %41, %42 : vector<16x128xf32>
    %44 = vector.extract_strided_slice %43 {offsets = [0, 0], sizes = [8, 128], strides = [1, 1]} : vector<16x128xf32> to vector<8x128xf32>
    %45 = vector.extract_strided_slice %43 {offsets = [8, 0], sizes = [8, 128], strides = [1, 1]} : vector<16x128xf32> to vector<8x128xf32>
    %46 = arith.addf %44, %45 : vector<8x128xf32>
    %cst_10 = arith.constant dense<0.000000e+00> : vector<128xf32>
    %47 = vector.multi_reduction <add>, %46, %cst_10 [0] : vector<8x128xf32> to vector<128xf32>
    %48 = vector.shape_cast %47 : vector<128xf32> to vector<1x128xf32>
    %49 = vector.extract_strided_slice %3 {offsets = [0, 0], sizes = [1, 1], strides = [1, 1]} : vector<2x1xf32> to vector<1x1xf32>
    %50 = vector.broadcast %49 : vector<1x1xf32> to vector<1x128xf32>
    %51 = arith.addf %48, %50 : vector<1x128xf32>
    %c0_11 = arith.constant 0 : index
    %c0_12 = arith.constant 0 : index
    %52 = vector.load %arg6[%c0_11, %c0_12] : memref<2x128xf32, #tpu.memory_space<vmem>>, vector<1x128xf32>
    tpu.vector_store %arg6[%c0_11, %c0_12], %51 {strides = array<i32>} : memref<2x128xf32, #tpu.memory_space<vmem>>, vector<1x128xf32>,
    %53 = vector.extract_strided_slice %2 {offsets = [0, 1], sizes = [32, 1], strides = [1, 1]} : vector<32x2xf32> to vector<32x1xf32>
    %54 = vector.broadcast %53 : vector<32x1xf32> to vector<32x128xf32>
    %55 = arith.mulf %37, %54 : vector<32x128xf32>
    %56 = vector.extract_strided_slice %55 {offsets = [0, 0], sizes = [16, 128], strides = [1, 1]} : vector<32x128xf32> to vector<16x128xf32>
    %57 = vector.extract_strided_slice %55 {offsets = [16, 0], sizes = [16, 128], strides = [1, 1]} : vector<32x128xf32> to vector<16x128xf32>
    %58 = arith.addf %56, %57 : vector<16x128xf32>
    %59 = vector.extract_strided_slice %58 {offsets = [0, 0], sizes = [8, 128], strides = [1, 1]} : vector<16x128xf32> to vector<8x128xf32>
    %60 = vector.extract_strided_slice %58 {offsets = [8, 0], sizes = [8, 128], strides = [1, 1]} : vector<16x128xf32> to vector<8x128xf32>
    %61 = arith.addf %59, %60 : vector<8x128xf32>
    %cst_13 = arith.constant dense<0.000000e+00> : vector<128xf32>
    %62 = vector.multi_reduction <add>, %61, %cst_13 [0] : vector<8x128xf32> to vector<128xf32>
    %63 = vector.shape_cast %62 : vector<128xf32> to vector<1x128xf32>
    %64 = vector.extract_strided_slice %3 {offsets = [1, 0], sizes = [1, 1], strides = [1, 1]} : vector<2x1xf32> to vector<1x1xf32>
    %65 = vector.broadcast %64 : vector<1x1xf32> to vector<1x128xf32>
    %66 = arith.addf %63, %65 : vector<1x128xf32>
    %c1 = arith.constant 1 : index
    %c0_14 = arith.constant 0 : index
    %67 = vector.load %arg6[%c1, %c0_14] : memref<2x128xf32, #tpu.memory_space<vmem>>, vector<1x128xf32>
    tpu.vector_store %arg6[%c1, %c0_14], %66 {strides = array<i32>} : memref<2x128xf32, #tpu.memory_space<vmem>>, vector<1x128xf32>,
    return
  }
  func.func @transform_0(%arg0: i32) -> (i32, i32) {
    %c0_i32 = arith.constant 0 : i32
    %c0_i32_0 = arith.constant 0 : i32
    return %c0_i32, %arg0 : i32, i32
  }
  func.func @transform_1(%arg0: i32) -> (i32, i32) {
    %c0_i32 = arith.constant 0 : i32
    %c0_i32_0 = arith.constant 0 : i32
    %c0_i32_1 = arith.constant 0 : i32
    return %c0_i32, %c0_i32_0 : i32, i32
  }
  func.func @transform_2(%arg0: i32) -> (i32, i32) {
    %c0_i32 = arith.constant 0 : i32
    %c0_i32_0 = arith.constant 0 : i32
    %c0_i32_1 = arith.constant 0 : i32
    return %c0_i32, %c0_i32_0 : i32, i32
  }
  func.func @transform_3(%arg0: i32) -> (i32, i32) {
    %c0_i32 = arith.constant 0 : i32
    %c0_i32_0 = arith.constant 0 : i32
    %c0_i32_1 = arith.constant 0 : i32
    return %c0_i32, %c0_i32_0 : i32, i32
  }
  func.func @transform_4(%arg0: i32) -> (i32, i32) {
    %c0_i32 = arith.constant 0 : i32
    %c0_i32_0 = arith.constant 0 : i32
    %c0_i32_1 = arith.constant 0 : i32
    return %c0_i32, %c0_i32_0 : i32, i32
  }
  func.func @transform_5(%arg0: i32) -> (i32, i32) {
    %c0_i32 = arith.constant 0 : i32
    %c0_i32_0 = arith.constant 0 : i32
    return %c0_i32, %arg0 : i32, i32
  }
}

</mosaic_0001>

<bundles_post_ra>
// kernel: schrodinger_fcnn_forward.1
= control target key start
LH: loop header
LB: loop body
LE: loop exit
PB: predicated region body
PF: predicated region fallthrough
CT: control target
= control target key end

     0   :  { %v338_v0 = vmov 0   ;;  %v339_v9 = vmov 1   ;;  %v340_v10 = vmov 2   ;;  %v341_v11 = vmov 3   ;;  %s442_s1 = inlined_call_operand.vmem [shape: f32[32,4], index: 1, kind: input, shape index: {}]   ;;  %s443_s2 = inlined_call_operand.vmem [shape: f32[32,1], index: 2, kind: input, shape index: {}]   ;;  %s444_s3 = inlined_call_operand.vmem [shape: f32[32,2], index: 3, kind: input, shape index: {}]   ;;  %s445_s4 = inlined_call_operand.vmem [shape: f32[2,1], index: 4, kind: input, shape index: {}]   ;;  %s446_s0 = inlined_call_operand.vmem [shape: f32[4,128], index: 0, kind: input, shape index: {}]   ;;  %s447_s5 = inlined_call_operand.vmem [shape: f32[2,128], index: 5, kind: output, shape index: {}]  }
   0x1   :  { %310 = vset.pattern.permute.xlu1 %v338_v0  ;;  %309 = vset.pattern.permute.xlu0 %v338_v0  ;;  %v22_v1 = vld [vmem:[%s442_s1 + $0x10] sm:$0xff]  ;;  %v20_v2 = vld [vmem:[%s442_s1] sm:$0xff]  ;;  %v23_v3 = vld [vmem:[%s442_s1 + $0x18] sm:$0xff]  ;;  %v54_v23 = vlaneseq }
   0x2   :  { %46 = vperm.xlu1 %310, %v22_v1   ;;  %36 = vperm.xlu0 %309, %v20_v2   ;;  %v21_v4 = vld [vmem:[%s442_s1 + $0x8] sm:$0xff]  ;;  %v24_v6 = vld [vmem:[%s443_s2] sm:$0xff]  ;;  %v27_v7 = vld [vmem:[%s443_s2 + $0x18] sm:$0xff] }
   0x3   :  { %v25_v5 = vld [vmem:[%s443_s2 + $0x8] sm:$0xff]  ;;  %v26_v8 = vld [vmem:[%s443_s2 + $0x10] sm:$0xff]  ;;  %v28_v13 = vld [vmem:[%s444_s3] sm:$0xff]  ;;  %v55_v26 = vshrl.u32 %v54_v23, 7 }
   0x4   :  { %v29_v12 = vld [vmem:[%s444_s3 + $0x8] sm:$0xff]  ;;  %v31_v14 = vld [vmem:[%s444_s3 + $0x18] sm:$0xff]  ;;  %v30_v15 = vld [vmem:[%s444_s3 + $0x10] sm:$0xff] }
   0x5   :  { %v32_v16 = vld [vmem:[%s445_s4] sm:$0x3]  ;;  %v56_v29 = vsub.s32 0, %v55_v26  ;;  %v104_v30 = vsub.s32 1, %v55_v26  ;;  %v132_v32 = vsub.s32 2, %v55_v26  ;;  %v160_v39 = vsub.s32 3, %v55_v26 }
   0x6   :  { %51 = vperm.xlu1 %310, %v23_v3   ;;  %41 = vperm.xlu0 %309, %v21_v4   ;;  %v33_v31 = vld [vmem:[%s446_s0] sm:$0xf] }
   0x7   :  { %v57_v35 = vrot.slane %v33_v31, %v56_v29  ;;  %v105_v36 = vrot.slane %v33_v31, %v104_v30  ;;  %v133_v38 = vrot.slane %v33_v31, %v132_v32  ;;  %v161_v45 = vrot.slane %v33_v31, %v160_v39 }
   0xa   :  { %69 = vperm.xlu1 %310, %v25_v5   ;;  %64 = vperm.xlu0 %309, %v24_v6  }
   0xe   :  { %79 = vperm.xlu1 %310, %v27_v7   ;;  %74 = vperm.xlu0 %309, %v26_v8  }
  0x12   :  { %312 = vset.pattern.permute.xlu1 %v339_v9  ;;  %311 = vset.pattern.permute.xlu0 %v339_v9 }
  0x13   :  { %91 = vperm.xlu1 %312, %v21_v4   ;;  %87 = vperm.xlu0 %311, %v20_v2  }
  0x17   :  { %95 = vperm.xlu1 %312, %v22_v1   ;;  %99 = vperm.xlu0 %311, %v23_v3  }
  0x1b   :  { %313 = vset.pattern.permute.xlu1 %v340_v10  ;;  %314 = vset.pattern.permute.xlu0 %v340_v10 }
  0x1c   :  { %115 = vperm.xlu1 %313, %v20_v2   ;;  %119 = vperm.xlu0 %314, %v21_v4  }
  0x20   :  { %123 = vperm.xlu1 %313, %v22_v1   ;;  %315 = vset.pattern.permute.xlu0 %v341_v11 }
  0x21   :  { %143 = vperm.xlu0 %315, %v20_v2  }
  0x24   :  { %127 = vperm.xlu1 %313, %v23_v3  }
  0x25   :  { %155 = vperm.xlu0 %315, %v23_v3  }
  0x28   :  { %316 = vset.pattern.permute.xlu1 %v341_v11 }
  0x29   :  { %147 = vperm.xlu1 %316, %v21_v4   ;;  %318 = vset.pattern.permute.xlu0 %v338_v0 }
  0x2a   :  { %237 = vperm.xlu0 %318, %v29_v12  }
  0x2d   :  { %151 = vperm.xlu1 %316, %v22_v1  }
  0x2e   :  { %319 = vset.pattern.permute.xlu0 %v339_v9 }
  0x2f   :  { %271 = vperm.xlu0 %319, %v28_v13  }
  0x31   :  { %317 = vset.pattern.permute.xlu1 %v338_v0 }
  0x32   :  { %232 = vperm.xlu1 %317, %v28_v13  }
  0x33   :  { %283 = vperm.xlu0 %319, %v31_v14  }
  0x36   :  { %242 = vperm.xlu1 %317, %v30_v15  }
  0x3a   :  { %247 = vperm.xlu1 %317, %v31_v14  }
  0x3e   :  { %320 = vset.pattern.permute.xlu1 %v339_v9 }
  0x3f   :  { %275 = vperm.xlu1 %320, %v29_v12  }
  0x43   :  { %279 = vperm.xlu1 %320, %v30_v15  }
  0x47   :  { %321 = vset.pattern.permute.xlu1 %v338_v0 }
  0x48   :  { %265 = vperm.xlu1 %321, %v32_v16  }
  0x81   :  { %v47_v17 = vpop.permute.xlu1 %46  ;;  %v37_v18 = vpop.permute.xlu0 %36 }
  0x82   :  { %v58_v37 = vmul.f32 %v57_v35, %v37_v18  ;;  %v60_v1 = vmul.f32 %v57_v35, %v47_v17 }
  0x85   :  { %v52_v19 = vpop.permute.xlu1 %51  ;;  %v42_v20 = vpop.permute.xlu0 %41 }
  0x86   :  { %v61_v48 = vmul.f32 %v57_v35, %v52_v19  ;;  %v59_v51 = vmul.f32 %v57_v35, %v42_v20 }
  0x89   :  { %v70_v21 = vpop.permute.xlu1 %69  ;;  %v65_v22 = vpop.permute.xlu0 %64 }
  0x8a   :  { %v82_v43 = vadd.f32 %v65_v22, %v58_v37  ;;  %v83_v61 = vadd.f32 %v70_v21, %v59_v51 }
  0x8d   :  { %v80_v24 = vpop.permute.xlu1 %79  ;;  %v75_v25 = vpop.permute.xlu0 %74 }
  0x8e   :  { %v85_v54 = vadd.f32 %v80_v24, %v61_v48  ;;  %v84_v6 = vadd.f32 %v75_v25, %v60_v1 }
  0x92   :  { %v92_v27 = vpop.permute.xlu1 %91  ;;  %v88_v28 = vpop.permute.xlu0 %87 }
  0x93   :  { %v106_v40 = vmul.f32 %v105_v36, %v88_v28  ;;  %v107_v55 = vmul.f32 %v105_v36, %v92_v27 }
  0x95   :  { %v110_v46 = vadd.f32 %v106_v40, %v82_v43  ;;  %v111_v3 = vadd.f32 %v107_v55, %v83_v61 }
  0x96   :  { %v96_v33 = vpop.permute.xlu1 %95  ;;  %v100_v34 = vpop.permute.xlu0 %99 }
  0x97   :  { %v109_v49 = vmul.f32 %v105_v36, %v100_v34  ;;  %v108_v4 = vmul.f32 %v105_v36, %v96_v33 }
  0x99   :  { %v113_v58 = vadd.f32 %v109_v49, %v85_v54  ;;  %v112_v14 = vadd.f32 %v108_v4, %v84_v6 }
  0x9b   :  { %v116_v41 = vpop.permute.xlu1 %115  ;;  %v120_v42 = vpop.permute.xlu0 %119 }
  0x9c   :  { %v134_v44 = vmul.f32 %v133_v38, %v116_v41  ;;  %v135_v62 = vmul.f32 %v133_v38, %v120_v42 }
  0x9e   :  { %v138_v52 = vadd.f32 %v134_v44, %v110_v46  ;;  %v139_v9 = vadd.f32 %v135_v62, %v111_v3 }
  0x9f   :  { %v124_v47 = vpop.permute.xlu1 %123 }
  0xa0   :  { %v144_v50 = vpop.permute.xlu0 %143  ;;  %v136_v10 = vmul.f32 %v133_v38, %v124_v47 }
  0xa1   :  { %v162_v53 = vmul.f32 %v161_v45, %v144_v50 }
  0xa2   :  { %v140_v18 = vadd.f32 %v136_v10, %v112_v14 }
  0xa3   :  { %v414_v56 = vadd.f32 %v162_v53, %v138_v52  ;;  %v128_v57 = vpop.permute.xlu1 %127 }
  0xa4   :  { %v137_v59 = vmul.f32 %v133_v38, %v128_v57  ;;  %v156_v60 = vpop.permute.xlu0 %155 }
  0xa5   :  { %v174_v63 = vand.u32 2147483647, %v414_v56  ;;  %v165_v0 = vmul.f32 %v161_v45, %v156_v60 }
  0xa6   :  { %v141_v2 = vadd.f32 %v137_v59, %v113_v58 }
  0xa7   :  { %v178_v5 = vsub.f32 0.0, %v174_v63 }
  0xa8   :  { %v417_v7 = vadd.f32 %v165_v0, %v141_v2  ;;  %v148_v8 = vpop.permute.xlu1 %147  ;;  %v170_v2 = vmax.f32 %v414_v56, 0.0 }
  0xa9   :  { %v182_v11 = vmul.f32 1.442695, %v178_v5  ;;  %v163_v12 = vmul.f32 %v161_v45, %v148_v8  ;;  %v238_v42 = vpop.permute.xlu0 %237 }
  0xaa   :  { %v177_v13 = vand.u32 2147483647, %v417_v7  ;;  %v173_v8 = vmax.f32 %v417_v7, 0.0 }
  0xab   :  { %322 = vpow2.f32 %v182_v11  ;;  %v420_v15 = vadd.f32 %v163_v12, %v139_v9 }
  0xac   :  { %v181_v16 = vsub.f32 0.0, %v177_v13  ;;  %v152_v17 = vpop.permute.xlu1 %151 }
  0xad   :  { %v175_v19 = vand.u32 2147483647, %v420_v15  ;;  %v164_v20 = vmul.f32 %v161_v45, %v152_v17  ;;  %v171_v58 = vmax.f32 %v420_v15, 0.0 }
  0xae   :  { %v188_v21 = vmul.f32 1.442695, %v181_v16  ;;  %v272_v63 = vpop.permute.xlu0 %271 }
  0xaf   :  { %v179_v22 = vsub.f32 0.0, %v175_v19  ;;  %v423_v23 = vadd.f32 %v164_v20, %v140_v18 }
  0xb0   :  { %324 = vpow2.f32 %v188_v21 }
  0xb1   :  { %v184_v24 = vmul.f32 1.442695, %v179_v22  ;;  %v176_v25 = vand.u32 2147483647, %v423_v23  ;;  %v233_v33 = vpop.permute.xlu1 %232  ;;  %v172_v13 = vmax.f32 %v423_v23, 0.0 }
  0xb2   :  { %v284_v16 = vpop.permute.xlu0 %283 }
  0xb3   :  { %326 = vpow2.f32 %v184_v24  ;;  %v180_v26 = vsub.f32 0.0, %v176_v25 }
  0xb5   :  { %v323_v27 = vpop.eup %322  ;;  %v186_v28 = vmul.f32 1.442695, %v180_v26  ;;  %v243_v38 = vpop.permute.xlu1 %242 }
  0xb6   :  { %v190_v29 = vadd.f32 1.0, %v323_v27  ;;  %v193_v36 = vmul.f32 -0.5, %v323_v27  ;;  %v196_v44 = vand.u32 2147483647, %v323_v27 }
  0xb7   :  { %328 = vpow2.f32 %v186_v28 }
  0xb8   :  { %330 = vlog2.f32 %v190_v29  ;;  %v194_v43 = vadd.f32 1.0, %v193_v36  ;;  %vm426_vm0 = vcmp.lt.f32.partialorder %v196_v44, 0.0004427343 }
  0xb9   :  { %v248_v52 = vpop.permute.xlu1 %247 }
  0xba   :  { %v325_v30 = vpop.eup %324  ;;  %v195_v55 = vmul.f32 %v323_v27, %v194_v43 }
  0xbb   :  { %v217_v31 = vadd.f32 1.0, %v325_v30  ;;  %v220_v39 = vmul.f32 -0.5, %v325_v30  ;;  %v223_v50 = vand.u32 2147483647, %v325_v30 }
  0xbd   :  { %v327_v32 = vpop.eup %326  ;;  %332 = vlog2.f32 %v217_v31  ;;  %v221_v47 = vadd.f32 1.0, %v220_v39  ;;  %vm224_vm1 = vcmp.lt.f32.partialorder %v223_v50, 0.0004427343 }
  0xbe   :  { %v199_v34 = vadd.f32 1.0, %v327_v32  ;;  %v202_v40 = vmul.f32 -0.5, %v327_v32  ;;  %v205_v51 = vand.u32 2147483647, %v327_v32  ;;  %v276_v5 = vpop.permute.xlu1 %275 }
  0xbf   :  { %v222_v60 = vmul.f32 %v325_v30, %v221_v47 }
  0xc0   :  { %334 = vlog2.f32 %v199_v34  ;;  %v203_v48 = vadd.f32 1.0, %v202_v40  ;;  %vm206_vm2 = vcmp.lt.f32.partialorder %v205_v51, 0.0004427343 }
  0xc1   :  { %v329_v35 = vpop.eup %328 }
  0xc2   :  { %v208_v37 = vadd.f32 1.0, %v329_v35  ;;  %v331_v41 = vpop.eup %330  ;;  %v211_v46 = vmul.f32 -0.5, %v329_v35  ;;  %v204_v62 = vmul.f32 %v327_v32, %v203_v48  ;;  %v214_v1 = vand.u32 2147483647, %v329_v35  ;;  %v280_v21 = vpop.permute.xlu1 %279 }
  0xc3   :  { %v192_v49 = vmul.f32 0.6931472, %v331_v41 }
  0xc4   :  { %336 = vlog2.f32 %v208_v37  ;;  %v212_v59 = vadd.f32 1.0, %v211_v46  ;;  %vm215_vm3 = vcmp.lt.f32.partialorder %v214_v1, 0.0004427343 }
  0xc5   :  { %v198_v0 = vsel %vm426_vm0, %v195_v55, %v192_v49 }
  0xc6   :  { %v226_v10 = vadd.f32 %v198_v0, %v170_v2  ;;  %v213_v12 = vmul.f32 %v329_v35, %v212_v59 }
  0xc7   :  { %v333_v45 = vpop.eup %332 }
  0xc8   :  { %v219_v53 = vmul.f32 0.6931472, %v333_v45  ;;  %v250_v56 = vmul.f32 %v233_v33, %v226_v10  ;;  %v286_v20 = vmul.f32 %v272_v63, %v226_v10 }
  0xca   :  { %v335_v54 = vpop.eup %334  ;;  %v225_v3 = vsel %vm224_vm1, %v222_v60, %v219_v53 }
  0xcb   :  { %v201_v61 = vmul.f32 0.6931472, %v335_v54  ;;  %v229_v14 = vadd.f32 %v225_v3, %v173_v8 }
  0xcd   :  { %v207_v4 = vsel %vm206_vm2, %v204_v62, %v201_v61  ;;  %v253_v24 = vmul.f32 %v248_v52, %v229_v14  ;;  %v289_v25 = vmul.f32 %v284_v16, %v229_v14 }
  0xce   :  { %v337_v6 = vpop.eup %336  ;;  %v227_v9 = vadd.f32 %v207_v4, %v171_v58 }
  0xcf   :  { %v210_v11 = vmul.f32 0.6931472, %v337_v6 }
  0xd0   :  { %v251_v18 = vmul.f32 %v238_v42, %v227_v9  ;;  %v287_v19 = vmul.f32 %v276_v5, %v227_v9 }
  0xd1   :  { %v216_v15 = vsel %vm215_vm3, %v213_v12, %v210_v11 }
  0xd2   :  { %v228_v17 = vadd.f32 %v216_v15, %v172_v13  ;;  %v255_v27 = vadd.f32 %v253_v24, %v251_v18  ;;  %v291_v28 = vadd.f32 %v289_v25, %v287_v19 }
  0xd4   :  { %v252_v22 = vmul.f32 %v243_v38, %v228_v17  ;;  %v288_v7 = vmul.f32 %v280_v21, %v228_v17  ;;  %v266_v38 = vpop.permute.xlu1 %265 }
  0xd6   :  { %v254_v26 = vadd.f32 %v252_v22, %v250_v56  ;;  %v290_v29 = vadd.f32 %v288_v7, %v286_v20 }
  0xd8   :  { %v256_v30 = vadd.f32 %v255_v27, %v254_v26  ;;  %v292_v23 = vadd.f32 %v291_v28, %v290_v29 }
  0xda   :  { %v257_v31 = vrot.slane %v256_v30, 4  ;;  %v293_v32 = vrot.slane %v292_v23, 4 }
  0xdc   :  { %v258_v34 = vadd.f32 %v257_v31, %v256_v30  ;;  %v294_v35 = vadd.f32 %v293_v32, %v292_v23 }
  0xde   :  { %v259_v36 = vrot.slane %v258_v34, 2  ;;  %v295_v37 = vrot.slane %v294_v35, 2 }
  0xe0   :  { %v260_v39 = vadd.f32 %v259_v36, %v258_v34  ;;  %v296_v33 = vadd.f32 %v295_v37, %v294_v35 }
  0xe2   :  { %v261_v40 = vrot.slane %v260_v39, 1  ;;  %v297_v41 = vrot.slane %v296_v33, 1 }
  0xe4   :  { %v262_v42 = vadd.f32 %v261_v40, %v260_v39  ;;  %v298_v43 = vadd.f32 %v297_v41, %v296_v33 }
  0xe6   :  { %v268_v44 = vadd.f32 %v266_v38, %v262_v42  ;;  %v299_v45 = vadd.f32 %v298_v43, %v266_v38 }
  0xe8   :  { %269 = vst [vmem:[%s447_s5] sm:$0x1] %v268_v44  ;;  %300 = vst [vmem:[%s447_s5] sm:$0x2] %v299_v45 }

</bundles_post_ra>
